<compile_context>
chip_gen: v7x
topology: tpu7x:2x2x1
jax: 0.10.0
libtpu: 0.0.40
codegen_flags: <defaults>
</compile_context>

<pallas_src>
import functools

import jax
import jax.numpy as jnp
from jax.experimental import pallas as pl
from jax.experimental.pallas import tpu as pltpu


def _round_up(v, m):
    return (v + m - 1) // m * m


def _pad_rows(a, n):
    return jnp.pad(a, ((0, n - a.shape[0]), (0, 0)))


def _layer_norm(x, gamma, beta, eps=1e-5):
    mu = jnp.mean(x, axis=-1, keepdims=True)
    var = jnp.mean((x - mu) ** 2, axis=-1, keepdims=True)
    return (x - mu) * jax.lax.rsqrt(var + eps) * gamma + beta


# ------------------------------------------------------------------
# Kernel 1: DeepGCN pre-norm + ReLU + GATv2 linear transforms (lin_l / lin_r)
#           emits gl (f32, for the transposed score stream), gr (f32, dst) and
#           glv (bf16 values) in one pass.
# ------------------------------------------------------------------
def gat_prep_kernel(x_ref, ln_g_ref, ln_b_ref, wl_ref, wr_ref,
                    gl_ref, gr_ref, glv_ref):
    x = x_ref[...]                                        # (TM, C) f32
    h = _layer_norm(x, ln_g_ref[...], ln_b_ref[...])      # f32 VPU math
    h = jnp.maximum(h, 0.0).astype(jnp.bfloat16)          # cast only at MXU boundary
    gl = jnp.dot(h, wl_ref[...], preferred_element_type=jnp.float32)
    gr = jnp.dot(h, wr_ref[...], preferred_element_type=jnp.float32)
    gl_ref[...] = gl
    gr_ref[...] = gr
    glv_ref[...] = gl.astype(jnp.bfloat16)                # bf16 values, no extra XLA pass


def run_gat_prep(x, ln_g, ln_b, wl_bf16, wr_bf16, *, tm):
    n_pad, c = x.shape
    hd = wl_bf16.shape[1]
    return pl.pallas_call(
        gat_prep_kernel,
        out_shape=(jax.ShapeDtypeStruct((n_pad, hd), jnp.float32),
                   jax.ShapeDtypeStruct((n_pad, hd), jnp.float32),
                   jax.ShapeDtypeStruct((n_pad, hd), jnp.bfloat16)),
        grid=(n_pad // tm,),
        in_specs=[pl.BlockSpec((tm, c), lambda i: (i, 0)),
                  pl.BlockSpec((1, c), lambda i: (0, 0)),
                  pl.BlockSpec((1, c), lambda i: (0, 0)),
                  pl.BlockSpec((c, hd), lambda i: (0, 0)),
                  pl.BlockSpec((c, hd), lambda i: (0, 0))],
        out_specs=(pl.BlockSpec((tm, hd), lambda i: (i, 0)),
                   pl.BlockSpec((tm, hd), lambda i: (i, 0)),
                   pl.BlockSpec((tm, hd), lambda i: (i, 0))),
        compiler_params=pltpu.CompilerParams(
            dimension_semantics=("parallel",),
            vmem_limit_bytes=32 * 1024 * 1024),
    )(x, ln_g, ln_b, wl_bf16, wr_bf16)


# ------------------------------------------------------------------
# Kernel 2: block-sparse flash-style GATv2 attention over (dst-tile, src-tile)
#           grid + conv bias + res+ residual.  Empty src tiles are skipped.
# ------------------------------------------------------------------
def gat_attn_kernel(flags_ref, att_ref, x_ref, gr_ref, glt_ref, glv_ref, adj_ref,
                    bias_ref, o_ref, m_sc, l_sc, acc_sc, *, heads, head_dim, nk):
    qi = pl.program_id(0)
    ki = pl.program_id(1)
    hd = heads * head_dim

    @pl.when(ki == 0)
    def _init():
        m_sc[...] = jnp.full_like(m_sc, -1e30)
        l_sc[...] = jnp.zeros_like(l_sc)
        acc_sc[...] = jnp.zeros_like(acc_sc)

    # skip all score/softmax/matmul work on source tiles with no edges
    @pl.when(flags_ref[qi * nk + ki] > 0)
    def _compute():
        adj = adj_ref[...].astype(jnp.float32)            # int8 -> f32 once per tile
        edge = adj > 0.0
        gr = gr_ref[...]                                  # (TQ, H*D) f32  dst (lin_r)
        glt = glt_ref[...]                                # (H*D, TK) f32  src (lin_l)^T
        glv = glv_ref[...]                                # (TK, H*D) bf16 src values
        neg = jnp.float32(-1e30)
        nrow = gr.shape[0]
        ncol = glt.shape[1]

        acc_parts = []
        for h in range(heads):
            lo = h * head_dim
            # leaky_relu(z) = 0.2*z + 0.8*relu(z); the linear part factors into
            # per-dst / per-src scalars (per row/col, ~free), so the per-channel
            # loop on the full (TQ,TK) tile is just add + relu + scale-accum.
            s_dst = jnp.zeros((nrow, 1), jnp.float32)
            s_src = jnp.zeros((1, ncol), jnp.float32)
            e = jnp.zeros(adj.shape, jnp.float32)
            for d in range(head_dim):
                c = lo + d
                a02 = att_ref[c]                          # 0.2 * att[h, d] (SMEM)
                a08 = att_ref[hd + c]                     # 0.8 * att[h, d] (SMEM)
                s_dst = s_dst + a02 * gr[:, c:c + 1]
                s_src = s_src + a02 * glt[c:c + 1, :]
                z = gr[:, c:c + 1] + glt[c:c + 1, :]      # (TQ,1)+(1,TK) -> (TQ,TK)
                e = e + a08 * jnp.maximum(z, 0.0)
            e = jnp.where(edge, e + s_dst + s_src, neg)   # mask non-edges

            # online softmax over source tiles
            m_prev = m_sc[:, h:h + 1]
            m_new = jnp.maximum(m_prev, jnp.max(e, axis=-1, keepdims=True))
            corr = jnp.exp(m_prev - m_new)
            p = jnp.exp(e - m_new) * adj                  # adj-mult keeps fully-masked rows at 0
            l_sc[:, h:h + 1] = corr * l_sc[:, h:h + 1] + jnp.sum(p, axis=-1, keepdims=True)
            m_sc[:, h:h + 1] = m_new
            acc_parts.append(
                corr * acc_sc[:, lo:lo + head_dim]
                + jnp.dot(p.astype(jnp.bfloat16), glv[:, lo:lo + head_dim],
                          preferred_element_type=jnp.float32))
        # single full-width accumulator write (no per-head masked sub-vreg stores)
        acc_sc[...] = jnp.concatenate(acc_parts, axis=1)

    @pl.when(ki == nk - 1)
    def _finalize():
        out_parts = []
        for h in range(heads):
            lo = h * head_dim
            inv = pl.reciprocal(l_sc[:, h:h + 1], approx=True)    # EUP (~free)
            out_parts.append(acc_sc[:, lo:lo + head_dim] * inv)
        # res+ residual + conv bias, one full-width output store
        o_ref[...] = x_ref[...] + jnp.concatenate(out_parts, axis=1) + bias_ref[...]


def run_gat_attn(flags, x, gr, glt, glv, adj, att_scaled, bias, *,
                 heads, head_dim, tq, tk):
    n_pad, c = x.shape
    hd = heads * head_dim
    nq, nk = n_pad // tq, n_pad // tk
    kernel = functools.partial(gat_attn_kernel, heads=heads, head_dim=head_dim, nk=nk)

    def _flag(qi, ki, f):
        return f[qi * nk + ki]

    grid_spec = pltpu.PrefetchScalarGridSpec(
        num_scalar_prefetch=1,                            # flags: block occupancy
        grid=(nq, nk),
        in_specs=[
            pl.BlockSpec(memory_space=pltpu.MemorySpace.SMEM),              # att (2*H*D,)
            pl.BlockSpec((tq, c), lambda qi, ki, f: (qi, 0)),               # x (residual)
            pl.BlockSpec((tq, hd), lambda qi, ki, f: (qi, 0)),              # gr (dst)
            # empty blocks collapse onto block 0 -> Pallas skips the re-fetch
            pl.BlockSpec((hd, tk), lambda qi, ki, f: (0, ki * _flag(qi, ki, f))),   # glt (src)
            pl.BlockSpec((tk, hd), lambda qi, ki, f: (ki * _flag(qi, ki, f), 0)),   # glv (src vals)
            pl.BlockSpec((tq, tk), lambda qi, ki, f: (qi, ki * _flag(qi, ki, f))),  # adj (int8)
            pl.BlockSpec((1, hd), lambda qi, ki, f: (0, 0)),                # conv bias
        ],
        out_specs=pl.BlockSpec((tq, c), lambda qi, ki, f: (qi, 0)),
        scratch_shapes=[pltpu.VMEM((tq, heads), jnp.float32),               # m
                        pltpu.VMEM((tq, heads), jnp.float32),               # l
                        pltpu.VMEM((tq, hd), jnp.float32)],                 # acc
    )
    return pl.pallas_call(
        kernel,
        out_shape=jax.ShapeDtypeStruct((n_pad, c), jnp.float32),
        grid_spec=grid_spec,
        compiler_params=pltpu.CompilerParams(
            dimension_semantics=("parallel", "arbitrary"),
            vmem_limit_bytes=32 * 1024 * 1024),
    )(flags, att_scaled, x, gr, glt, glv, adj, bias)


# ------------------------------------------------------------------
# Kernel 3: edgeMLP = LayerNorm(2C) -> ReLU -> Linear(2C, C); edge_attr += eAttr
# ------------------------------------------------------------------
def edge_mlp_kernel(feat_ref, ln_g_ref, ln_b_ref, w_ref, b_ref, eattr_ref, out_ref):
    f = feat_ref[...]                                     # (TE, 2C)
    h = _layer_norm(f, ln_g_ref[...], ln_b_ref[...])
    h = jnp.maximum(h, 0.0).astype(jnp.bfloat16)
    y = jnp.dot(h, w_ref[...], preferred_element_type=jnp.float32) + b_ref[...]
    out_ref[...] = eattr_ref[...] + y


def run_edge_mlp(feat, ln_g, ln_b, w_bf16, b, edge_attr, *, te):
    e_pad, c2 = feat.shape
    c = edge_attr.shape[1]
    return pl.pallas_call(
        edge_mlp_kernel,
        out_shape=jax.ShapeDtypeStruct((e_pad, c), jnp.float32),
        grid=(e_pad // te,),
        in_specs=[pl.BlockSpec((te, c2), lambda i: (i, 0)),
                  pl.BlockSpec((1, c2), lambda i: (0, 0)),
                  pl.BlockSpec((1, c2), lambda i: (0, 0)),
                  pl.BlockSpec((c2, c), lambda i: (0, 0)),
                  pl.BlockSpec((1, c), lambda i: (0, 0)),
                  pl.BlockSpec((te, c), lambda i: (i, 0))],
        out_specs=pl.BlockSpec((te, c), lambda i: (i, 0)),
        compiler_params=pltpu.CompilerParams(
            dimension_semantics=("parallel",),
            vmem_limit_bytes=32 * 1024 * 1024),
    )(feat, ln_g, ln_b, w_bf16, b, edge_attr)


# ------------------------------------------------------------------
# Forward wrapper (mirror of DeepGCN_Node.forward -> (graph.x, graph.edge_attr))
# ------------------------------------------------------------------
def deepgcn_node_forward(x, edge_index, edge_attr, params, *, tq=None, tk=128):
    N, C = x.shape
    H, D = params["heads"], params["head_dim"]
    HD = H * D
    assert C == HD, "res+ residual requires dim_in == heads * head_dim"

    n_pad = _round_up(max(N, 1), tk)
    if tq is None:
        # keep >= 2 dst blocks so the 'parallel' axis spans both TCs (v7x megacore);
        # on v5e/v6e with large graphs, raise tq/tk (256-512) + vmem_limit instead.
        tq = 128 if n_pad >= 256 else 64
    n_pad = _round_up(n_pad, tq)
    assert n_pad % tq == 0 and n_pad % tk == 0

    x_p = _pad_rows(x.astype(jnp.float32), n_pad)

    # int8 dense adjacency incl. self loops (also on pad rows so every softmax
    # row has >= 1 unmasked entry); adj[dst, src] = 1.
    # TODO(synk): duplicate (multigraph) edges collapse to a single 1 here.
    src, dst = edge_index[0], edge_index[1]
    adj = jnp.zeros((n_pad, n_pad), jnp.int8)
    adj = adj.at[dst, src].set(1)
    adj = adj.at[jnp.arange(n_pad), jnp.arange(n_pad)].set(1)

    # per-(dst-tile, src-tile) occupancy flags for block-sparse skipping
    nq, nk = n_pad // tq, n_pad // tk
    flags = jnp.any(adj.reshape(nq, tq, nk, tk) != 0, axis=(1, 3))
    flags = flags.astype(jnp.int32).reshape(-1)           # (nq*nk,) in SMEM via prefetch

    wl_bf = params["wl"].astype(jnp.bfloat16)
    wr_bf = params["wr"].astype(jnp.bfloat16)
    tm = min(128, n_pad)
    gl, gr, glv = run_gat_prep(x_p, params["ln_g"], params["ln_b"], wl_bf, wr_bf, tm=tm)
    # TODO(synk): emit glt transposed (ideally bf16) straight from the prep kernel
    #             to drop this standalone XLA transpose pass.
    glt = gl.T                                            # (H*D, n_pad) src rows lane-aligned

    # 0.2*att (linear part of leaky_relu) and 0.8*att (relu part), pre-scaled
    att_flat = params["att"].reshape(-1).astype(jnp.float32)
    att_scaled = jnp.concatenate([0.2 * att_flat, 0.8 * att_flat])

    x_new_p = run_gat_attn(flags, x_p, gr, glt, glv, adj, att_scaled,
                           params["conv_bias"], heads=H, head_dim=D, tq=tq, tk=tk)
    x_new = x_new_p[:N]

    # glue: per-edge gather + concat (x_src || x_dst)
    # TODO(synk): fuse this gather into the edge-MLP kernel (scalar-prefetched
    #             src/dst + DMA gather) to avoid the (E, 2C) HBM round trip.
    feat = jnp.concatenate([x_new[src], x_new[dst]], axis=-1)   # (E, 2C)

    E = edge_attr.shape[0]
    te = 128 if E >= 128 else _round_up(E, 8)
    e_pad = _round_up(E, te)
    feat_p = _pad_rows(feat, e_pad)
    ea_p = _pad_rows(edge_attr.astype(jnp.float32), e_pad)
    e_new_p = run_edge_mlp(feat_p, params["mlp_ln_g"], params["mlp_ln_b"],
                           params["mlp_w"].astype(jnp.bfloat16),
                           params["mlp_b"], ea_p, te=te)
    return x_new, e_new_p[:E]


if __name__ == "__main__":
    key = jax.random.PRNGKey(0)
    N, C, H = 16, 32, 4          # nodes, dim_in == dim_out, node heads
    D = C // H                   # per-head dim (dim_out // __node_heads)

    # deterministic edge structure: ring + skip-3 (no duplicate edges)
    src = jnp.concatenate([jnp.arange(N), jnp.arange(N)])
    dst = jnp.concatenate([(jnp.arange(N) + 1) % N, (jnp.arange(N) + 3) % N])
    edge_index = jnp.stack([src, dst]).astype(jnp.int32)  # (2, E)
    E = edge_index.shape[1]

    keys = jax.random.split(key, 8)
    x = jax.random.normal(keys[0], (N, C), jnp.float32)
    edge_attr = jax.random.normal(keys[1], (E, C), jnp.float32)

    params = dict(
        heads=H, head_dim=D,
        # DeepGCN layer norm (LayerNorm(dim_in), affine)
        ln_g=jnp.ones((1, C), jnp.float32),
        ln_b=jnp.zeros((1, C), jnp.float32),
        # GATv2Conv: lin_l / lin_r (dim_in -> heads*head_dim), att (H, D), bias
        wl=0.1 * jax.random.normal(keys[2], (C, H * D), jnp.float32),
        wr=0.1 * jax.random.normal(keys[3], (C, H * D), jnp.float32),
        att=0.1 * jax.random.normal(keys[4], (H, D), jnp.float32),
        conv_bias=jnp.zeros((1, H * D), jnp.float32),
        # edgeMLP: LayerNorm(2C) -> ReLU -> Linear(2C, C)
        mlp_ln_g=jnp.ones((1, 2 * C), jnp.float32),
        mlp_ln_b=jnp.zeros((1, 2 * C), jnp.float32),
        mlp_w=0.1 * jax.random.normal(keys[5], (2 * C, C), jnp.float32),
        mlp_b=jnp.zeros((1, C), jnp.float32),
    )

    x_out, e_out = deepgcn_node_forward(x, edge_index, edge_attr, params)
    jax.block_until_ready((x_out, e_out))

    assert x_out.shape == (N, C) and e_out.shape == (E, C)
    assert bool(jnp.all(jnp.isfinite(x_out))) and bool(jnp.all(jnp.isfinite(e_out)))
    print("KERNEL_OK")
</pallas_src>

<mosaic_0001>
module attributes {stable_mosaic.version = 11 : i64} {
  func.func @gat_prep_kernel(%arg0: i32, %arg1: memref<128x32xf32, #tpu.memory_space<vmem>>, %arg2: memref<1x32xf32, #tpu.memory_space<vmem>>, %arg3: memref<1x32xf32, #tpu.memory_space<vmem>>, %arg4: memref<32x32xbf16, #tpu.memory_space<vmem>>, %arg5: memref<32x32xbf16, #tpu.memory_space<vmem>>, %arg6: memref<128x32xf32, #tpu.memory_space<vmem>>, %arg7: memref<128x32xf32, #tpu.memory_space<vmem>>, %arg8: memref<128x32xbf16, #tpu.memory_space<vmem>>) attributes {dimension_semantics = [#tpu.dimension_semantics<parallel>], iteration_bounds = array<i64: 1>, scalar_prefetch = 0 : i64, scratch_operands = 0 : i64, tpu.core_type = #tpu.core_type<tc>, window_params = [{transform_indices = @transform_0, window_bounds = array<i64: 128, 32>}, {pipeline_mode = #tpu.pipeline_mode<synchronous>, transform_indices = @transform_1, window_bounds = array<i64: 1, 32>}, {pipeline_mode = #tpu.pipeline_mode<synchronous>, transform_indices = @transform_2, window_bounds = array<i64: 1, 32>}, {pipeline_mode = #tpu.pipeline_mode<synchronous>, transform_indices = @transform_3, window_bounds = array<i64: 32, 32>}, {pipeline_mode = #tpu.pipeline_mode<synchronous>, transform_indices = @transform_4, window_bounds = array<i64: 32, 32>}, {transform_indices = @transform_5, window_bounds = array<i64: 128, 32>}, {transform_indices = @transform_6, window_bounds = array<i64: 128, 32>}, {transform_indices = @transform_7, window_bounds = array<i64: 128, 32>}]} {
    %c0 = arith.constant 0 : index
    %c0_0 = arith.constant 0 : index
    %0 = vector.load %arg1[%c0, %c0_0] : memref<128x32xf32, #tpu.memory_space<vmem>>, vector<128x32xf32>
    %c0_1 = arith.constant 0 : index
    %c0_2 = arith.constant 0 : index
    %1 = vector.load %arg2[%c0_1, %c0_2] : memref<1x32xf32, #tpu.memory_space<vmem>>, vector<1x32xf32>
    %c0_3 = arith.constant 0 : index
    %c0_4 = arith.constant 0 : index
    %2 = vector.load %arg3[%c0_3, %c0_4] : memref<1x32xf32, #tpu.memory_space<vmem>>, vector<1x32xf32>
    %cst = arith.constant dense<0.000000e+00> : vector<128xf32>
    %3 = vector.multi_reduction <add>, %0, %cst [1] : vector<128x32xf32> to vector<128xf32>
    %4 = vector.shape_cast %3 : vector<128xf32> to vector<128x1xf32>
    %cst_5 = arith.constant 3.200000e+01 : f32
    %5 = vector.broadcast %cst_5 : f32 to vector<128x1xf32>
    %6 = arith.divf %4, %5 : vector<128x1xf32>
    %7 = vector.broadcast %6 : vector<128x1xf32> to vector<128x32xf32>
    %8 = arith.subf %0, %7 : vector<128x32xf32>
    %9 = arith.mulf %8, %8 : vector<128x32xf32>
    %cst_6 = arith.constant dense<0.000000e+00> : vector<128xf32>
    %10 = vector.multi_reduction <add>, %9, %cst_6 [1] : vector<128x32xf32> to vector<128xf32>
    %11 = vector.shape_cast %10 : vector<128xf32> to vector<128x1xf32>
    %cst_7 = arith.constant 3.200000e+01 : f32
    %12 = vector.broadcast %cst_7 : f32 to vector<128x1xf32>
    %13 = arith.divf %11, %12 : vector<128x1xf32>
    %14 = vector.broadcast %6 : vector<128x1xf32> to vector<128x32xf32>
    %15 = arith.subf %0, %14 : vector<128x32xf32>
    %cst_8 = arith.constant 9.99999974E-6 : f32
    %16 = vector.broadcast %cst_8 : f32 to vector<128x1xf32>
    %17 = arith.addf %13, %16 : vector<128x1xf32>
    %18 = math.rsqrt %17 : vector<128x1xf32>
    %19 = vector.broadcast %18 : vector<128x1xf32> to vector<128x32xf32>
    %20 = arith.mulf %15, %19 : vector<128x32xf32>
    %21 = vector.broadcast %1 : vector<1x32xf32> to vector<128x32xf32>
    %22 = arith.mulf %20, %21 : vector<128x32xf32>
    %23 = vector.broadcast %2 : vector<1x32xf32> to vector<128x32xf32>
    %24 = arith.addf %22, %23 : vector<128x32xf32>
    %cst_9 = arith.constant 0.000000e+00 : f32
    %25 = vector.broadcast %cst_9 : f32 to vector<128x32xf32>
    %26 = arith.maximumf %24, %25 : vector<128x32xf32>
    %27 = arith.truncf %26 : vector<128x32xf32> to vector<128x32xbf16>
    %c0_10 = arith.constant 0 : index
    %c0_11 = arith.constant 0 : index
    %28 = vector.load %arg4[%c0_10, %c0_11] : memref<32x32xbf16, #tpu.memory_space<vmem>>, vector<32x32xbf16>
    %cst_12 = arith.constant dense<0.000000e+00> : vector<128x32xf32>
    %29 = tpu.matmul %27, %28, %cst_12 {dimension_numbers = #tpu.dot_dimension_numbers<[1], [0], [0], [1], [0, 0, 1, 1], [], []>} : vector<128x32xbf16>, vector<32x32xbf16>, vector<128x32xf32> -> vector<128x32xf32>
    %c0_13 = arith.constant 0 : index
    %c0_14 = arith.constant 0 : index
    %30 = vector.load %arg5[%c0_13, %c0_14] : memref<32x32xbf16, #tpu.memory_space<vmem>>, vector<32x32xbf16>
    %cst_15 = arith.constant dense<0.000000e+00> : vector<128x32xf32>
    %31 = tpu.matmul %27, %30, %cst_15 {dimension_numbers = #tpu.dot_dimension_numbers<[1], [0], [0], [1], [0, 0, 1, 1], [], []>} : vector<128x32xbf16>, vector<32x32xbf16>, vector<128x32xf32> -> vector<128x32xf32>
    %c0_16 = arith.constant 0 : index
    %c0_17 = arith.constant 0 : index
    %32 = vector.load %arg6[%c0_16, %c0_17] : memref<128x32xf32, #tpu.memory_space<vmem>>, vector<128x32xf32>
    tpu.vector_store %arg6[%c0_16, %c0_17], %29 {strides = array<i32>} : memref<128x32xf32, #tpu.memory_space<vmem>>, vector<128x32xf32>,
    %c0_18 = arith.constant 0 : index
    %c0_19 = arith.constant 0 : index
    %33 = vector.load %arg7[%c0_18, %c0_19] : memref<128x32xf32, #tpu.memory_space<vmem>>, vector<128x32xf32>
    tpu.vector_store %arg7[%c0_18, %c0_19], %31 {strides = array<i32>} : memref<128x32xf32, #tpu.memory_space<vmem>>, vector<128x32xf32>,
    %34 = arith.truncf %29 : vector<128x32xf32> to vector<128x32xbf16>
    %c0_20 = arith.constant 0 : index
    %c0_21 = arith.constant 0 : index
    %35 = vector.load %arg8[%c0_20, %c0_21] : memref<128x32xbf16, #tpu.memory_space<vmem>>, vector<128x32xbf16>
    tpu.vector_store %arg8[%c0_20, %c0_21], %34 {strides = array<i32>} : memref<128x32xbf16, #tpu.memory_space<vmem>>, vector<128x32xbf16>,
    return
  }
  func.func @transform_0(%arg0: i32) -> (i32, i32) {
    %c0_i32 = arith.constant 0 : i32
    %c0_i32_0 = arith.constant 0 : i32
    return %arg0, %c0_i32 : i32, i32
  }
  func.func @transform_1(%arg0: i32) -> (i32, i32) {
    %c0_i32 = arith.constant 0 : i32
    %c0_i32_0 = arith.constant 0 : i32
    %c0_i32_1 = arith.constant 0 : i32
    return %c0_i32, %c0_i32_0 : i32, i32
  }
  func.func @transform_2(%arg0: i32) -> (i32, i32) {
    %c0_i32 = arith.constant 0 : i32
    %c0_i32_0 = arith.constant 0 : i32
    %c0_i32_1 = arith.constant 0 : i32
    return %c0_i32, %c0_i32_0 : i32, i32
  }
  func.func @transform_3(%arg0: i32) -> (i32, i32) {
    %c0_i32 = arith.constant 0 : i32
    %c0_i32_0 = arith.constant 0 : i32
    %c0_i32_1 = arith.constant 0 : i32
    return %c0_i32, %c0_i32_0 : i32, i32
  }
  func.func @transform_4(%arg0: i32) -> (i32, i32) {
    %c0_i32 = arith.constant 0 : i32
    %c0_i32_0 = arith.constant 0 : i32
    %c0_i32_1 = arith.constant 0 : i32
    return %c0_i32, %c0_i32_0 : i32, i32
  }
  func.func @transform_5(%arg0: i32) -> (i32, i32) {
    %c0_i32 = arith.constant 0 : i32
    %c0_i32_0 = arith.constant 0 : i32
    return %arg0, %c0_i32 : i32, i32
  }
  func.func @transform_6(%arg0: i32) -> (i32, i32) {
    %c0_i32 = arith.constant 0 : i32
    %c0_i32_0 = arith.constant 0 : i32
    return %arg0, %c0_i32 : i32, i32
  }
  func.func @transform_7(%arg0: i32) -> (i32, i32) {
    %c0_i32 = arith.constant 0 : i32
    %c0_i32_0 = arith.constant 0 : i32
    return %arg0, %c0_i32 : i32, i32
  }
}

</mosaic_0001>

<bundles_post_ra>
// kernel: tpu_custom_call.1
= control target key start
LH: loop header
LB: loop body
LE: loop exit
PB: predicated region body
PF: predicated region fallthrough
CT: control target
= control target key end

     0   :  { %vm42_vm0 = vcmask 261120   ;;  %vm666_vm1 = vcmask 257024   ;;  %s1347_s0 = inlined_call_operand.vmem [shape: f32[128,32], index: 0, kind: input, shape index: {}]   ;;  %s1348_s3 = inlined_call_operand.vmem [shape: bf16[32,32], index: 3, kind: input, shape index: {}]   ;;  %s1349_s4 = inlined_call_operand.vmem [shape: bf16[32,32], index: 4, kind: input, shape index: {}]   ;;  %s1350_s1 = inlined_call_operand.vmem [shape: f32[1,32], index: 1, kind: input, shape index: {}]   ;;  %s1351_s2 = inlined_call_operand.vmem [shape: f32[1,32], index: 2, kind: input, shape index: {}]   ;;  %s1352_s5 = inlined_call_operand.vmem [shape: f32[128,32], index: 5, kind: output, shape index: {0}]   ;;  %s1353_s6 = inlined_call_operand.vmem [shape: f32[128,32], index: 6, kind: output, shape index: {1}]   ;;  %s1354_s7 = inlined_call_operand.vmem [shape: bf16[128,32], index: 7, kind: output, shape index: {2}]  }
   0x1   :  { %v24_v0 = vld [vmem:[%s1347_s0] sm:$0xff]  ;;  %v26_v1 = vld [vmem:[%s1347_s0 + $0x10] sm:$0xff]  ;;  %v25_v2 = vld [vmem:[%s1347_s0 + $0x8] sm:$0xff] }
   0x2   :  { %v43_v3 = vsel %vm42_vm0, %v24_v0, 0.0  ;;  %v49_v4 = vsel %vm42_vm0, %v26_v1, 0.0  ;;  %v27_v5 = vld [vmem:[%s1347_s0 + $0x18] sm:$0xff]  ;;  %v46_v6 = vsel %vm42_vm0, %v25_v2, 0.0  ;;  %v28_v8 = vld [vmem:[%s1347_s0 + $0x20] sm:$0xff]  ;;  %v29_v9 = vld [vmem:[%s1347_s0 + $0x28] sm:$0xff] }
   0x3   :  { %44 = vadd.xlane.f32.xlu0 %v43_v3  ;;  %50 = vadd.xlane.f32.xlu1 %v49_v4  ;;  %v52_v7 = vsel %vm42_vm0, %v27_v5, 0.0  ;;  %v55_v10 = vsel %vm42_vm0, %v28_v8, 0.0  ;;  %v58_v11 = vsel %vm42_vm0, %v29_v9, 0.0  ;;  %v912_v12 = vld [vmem:[%s1347_s0 + $0x30] sm:$0xff]  ;;  %v917_v13 = vld [vmem:[%s1347_s0 + $0x38] sm:$0xff]  ;;  %v926_v16 = vld [vmem:[%s1347_s0 + $0x40] sm:$0xff] }
   0x4   :  { %v61_v14 = vsel %vm42_vm0, %v912_v12, 0.0  ;;  %v64_v15 = vsel %vm42_vm0, %v917_v13, 0.0  ;;  %v931_v17 = vld [vmem:[%s1347_s0 + $0x48] sm:$0xff]  ;;  %v67_v18 = vsel %vm42_vm0, %v926_v16, 0.0  ;;  %v940_v20 = vld [vmem:[%s1347_s0 + $0x50] sm:$0xff]  ;;  %v945_v21 = vld [vmem:[%s1347_s0 + $0x58] sm:$0xff] }
   0x5   :  { %v70_v19 = vsel %vm42_vm0, %v931_v17, 0.0  ;;  %v73_v22 = vsel %vm42_vm0, %v940_v20, 0.0  ;;  %v76_v23 = vsel %vm42_vm0, %v945_v21, 0.0  ;;  %v954_v24 = vld [vmem:[%s1347_s0 + $0x60] sm:$0xff]  ;;  %v959_v25 = vld [vmem:[%s1347_s0 + $0x68] sm:$0xff]  ;;  %v968_v28 = vld [vmem:[%s1347_s0 + $0x70] sm:$0xff] }
   0x6   :  { %v79_v26 = vsel %vm42_vm0, %v954_v24, 0.0  ;;  %v82_v27 = vsel %vm42_vm0, %v959_v25, 0.0  ;;  %v973_v29 = vld [vmem:[%s1347_s0 + $0x78] sm:$0xff]  ;;  %v85_v30 = vsel %vm42_vm0, %v968_v28, 0.0 }
   0x7   :  { %47 = vadd.xlane.f32.xlu0 %v46_v6  ;;  %53 = vadd.xlane.f32.xlu1 %v52_v7  ;;  %v88_v31 = vsel %vm42_vm0, %v973_v29, 0.0 }
   0xb   :  { %56 = vadd.xlane.f32.xlu0 %v55_v10  ;;  %59 = vadd.xlane.f32.xlu1 %v58_v11 }
   0xf   :  { %62 = vadd.xlane.f32.xlu0 %v61_v14  ;;  %65 = vadd.xlane.f32.xlu1 %v64_v15 }
  0x13   :  { %68 = vadd.xlane.f32.xlu0 %v67_v18  ;;  %71 = vadd.xlane.f32.xlu1 %v70_v19 }
  0x17   :  { %74 = vadd.xlane.f32.xlu0 %v73_v22  ;;  %77 = vadd.xlane.f32.xlu1 %v76_v23 }
  0x1b   :  { %80 = vadd.xlane.f32.xlu0 %v79_v26  ;;  %83 = vadd.xlane.f32.xlu1 %v82_v27 }
  0x1f   :  { %86 = vadd.xlane.f32.xlu0 %v85_v30  ;;  %89 = vadd.xlane.f32.xlu1 %v88_v31 }
  0x90   :  { %v45_v32 = vpop.xlane.xlu0 %44  ;;  %v51_v33 = vpop.xlane.xlu1 %50 }
  0x91   :  { %v92_v34 = vmul.f32 0.03125, %v45_v32  ;;  %v94_v35 = vmul.f32 0.03125, %v51_v33 }
  0x93   :  { %v979_v36 = vsub.f32 %v24_v0, %v92_v34  ;;  %v981_v37 = vsub.f32 %v26_v1, %v94_v35 }
  0x94   :  { %v48_v38 = vpop.xlane.xlu0 %47  ;;  %v54_v39 = vpop.xlane.xlu1 %53 }
  0x95   :  { %v93_v40 = vmul.f32 0.03125, %v48_v38  ;;  %v95_v41 = vmul.f32 0.03125, %v54_v39  ;;  %v124_v42 = vmul.f32 %v979_v36, %v979_v36  ;;  %v126_v43 = vmul.f32 %v981_v37, %v981_v37 }
  0x97   :  { %v987_v44 = vsub.f32 %v25_v2, %v93_v40  ;;  %v989_v45 = vsub.f32 %v27_v5, %v95_v41  ;;  %v140_v46 = vsel %vm42_vm0, %v124_v42, 0.0  ;;  %v146_v49 = vsel %vm42_vm0, %v126_v43, 0.0 }
  0x98   :  { %141 = vadd.xlane.f32.xlu0 %v140_v46  ;;  %v57_v47 = vpop.xlane.xlu0 %56  ;;  %v60_v48 = vpop.xlane.xlu1 %59 }
  0x99   :  { %v96_v50 = vmul.f32 0.03125, %v57_v47  ;;  %v97_v51 = vmul.f32 0.03125, %v60_v48  ;;  %v125_v52 = vmul.f32 %v987_v44, %v987_v44  ;;  %v127_v53 = vmul.f32 %v989_v45, %v989_v45 }
  0x9b   :  { %v997_v54 = vsub.f32 %v28_v8, %v96_v50  ;;  %v999_v55 = vsub.f32 %v29_v9, %v97_v51  ;;  %v143_v56 = vsel %vm42_vm0, %v125_v52, 0.0  ;;  %v149_v59 = vsel %vm42_vm0, %v127_v53, 0.0  ;;  %v810_v53 = vld [vmem:[%s1349_s4] sm:$0xff]  }
  0x9c   :  { %147 = vadd.xlane.f32.xlu0 %v146_v49  ;;  %144 = vadd.xlane.f32.xlu1 %v143_v56  ;;  %v63_v57 = vpop.xlane.xlu0 %62  ;;  %v66_v58 = vpop.xlane.xlu1 %65  ;;  %v811_v56 = vld [vmem:[%s1348_s3 + $0x8] sm:$0xff]  }
  0x9d   :  { %v98_v60 = vmul.f32 0.03125, %v63_v57  ;;  %v99_v61 = vmul.f32 0.03125, %v66_v58  ;;  %v128_v62 = vmul.f32 %v997_v54, %v997_v54  ;;  %v129_v63 = vmul.f32 %v999_v55, %v999_v55  ;;  %789 = vmatprep.subr.bf16.mxu1 %v810_v53  ;;  %v812_v57 = vld [vmem:[%s1349_s4 + $0x8] sm:$0xff]  }
  0x9e   :  { %790 = vmatpush3.bf16.msra.mxu1 %v810_v53 }
  0x9f   :  { %v1008_v0 = vsub.f32 %v912_v12, %v98_v60  ;;  %v1011_v1 = vsub.f32 %v917_v13, %v99_v61  ;;  %v152_v2 = vsel %vm42_vm0, %v128_v62, 0.0  ;;  %v155_v5 = vsel %vm42_vm0, %v129_v63, 0.0  ;;  %791 = vmatprep.subr.bf16.mxu1 %v812_v57 }
  0xa0   :  { %150 = vadd.xlane.f32.xlu1 %v149_v59  ;;  %153 = vadd.xlane.f32.xlu0 %v152_v2  ;;  %v69_v3 = vpop.xlane.xlu0 %68  ;;  %v72_v4 = vpop.xlane.xlu1 %71 }
  0xa1   :  { %v100_v6 = vmul.f32 0.03125, %v69_v3  ;;  %v101_v7 = vmul.f32 0.03125, %v72_v4  ;;  %v130_v8 = vmul.f32 %v1008_v0, %v1008_v0  ;;  %v131_v9 = vmul.f32 %v1011_v1, %v1011_v1 }
  0xa2   :  { %792 = vmatpush3.bf16.msra.mxu1 %v812_v57 }
  0xa3   :  { %v1020_v10 = vsub.f32 %v926_v16, %v100_v6  ;;  %v1023_v11 = vsub.f32 %v931_v17, %v101_v7  ;;  %v158_v12 = vsel %vm42_vm0, %v130_v8, 0.0  ;;  %v161_v15 = vsel %vm42_vm0, %v131_v9, 0.0 }
  0xa4   :  { %156 = vadd.xlane.f32.xlu1 %v155_v5  ;;  %159 = vadd.xlane.f32.xlu0 %v158_v12  ;;  %v75_v13 = vpop.xlane.xlu0 %74  ;;  %v78_v14 = vpop.xlane.xlu1 %77 }
  0xa5   :  { %v102_v18 = vmul.f32 0.03125, %v75_v13  ;;  %v103_v19 = vmul.f32 0.03125, %v78_v14  ;;  %v132_v22 = vmul.f32 %v1020_v10, %v1020_v10  ;;  %v133_v16 = vmul.f32 %v1023_v11, %v1023_v11 }
  0xa7   :  { %v1032_v23 = vsub.f32 %v940_v20, %v102_v18  ;;  %v1035_v17 = vsub.f32 %v945_v21, %v103_v19  ;;  %v164_v26 = vsel %vm42_vm0, %v132_v22, 0.0  ;;  %v167_v31 = vsel %vm42_vm0, %v133_v16, 0.0 }
  0xa8   :  { %162 = vadd.xlane.f32.xlu1 %v161_v15  ;;  %165 = vadd.xlane.f32.xlu0 %v164_v26  ;;  %v81_v27 = vpop.xlane.xlu0 %80  ;;  %v84_v30 = vpop.xlane.xlu1 %83  ;;  %v1084_v26 = vld [vmem:[%s1350_s1] ss:$0 sm:$0xff] }
  0xa9   :  { %v104_v32 = vmul.f32 0.03125, %v81_v27  ;;  %v105_v33 = vmul.f32 0.03125, %v84_v30  ;;  %v134_v34 = vmul.f32 %v1032_v23, %v1032_v23  ;;  %v135_v20 = vmul.f32 %v1035_v17, %v1035_v17 }
  0xab   :  { %v1044_v35 = vsub.f32 %v954_v24, %v104_v32  ;;  %v1047_v21 = vsub.f32 %v959_v25, %v105_v33  ;;  %v170_v38 = vsel %vm42_vm0, %v134_v34, 0.0  ;;  %v173_v41 = vsel %vm42_vm0, %v135_v20, 0.0  ;;  %v1090_v34 = vld [vmem:[%s1351_s2] ss:$0 sm:$0xff] }
  0xac   :  { %168 = vadd.xlane.f32.xlu1 %v167_v31  ;;  %171 = vadd.xlane.f32.xlu0 %v170_v38  ;;  %v87_v39 = vpop.xlane.xlu0 %86  ;;  %v90_v40 = vpop.xlane.xlu1 %89 }
  0xad   :  { %v106_v42 = vmul.f32 0.03125, %v87_v39  ;;  %v107_v43 = vmul.f32 0.03125, %v90_v40  ;;  %v136_v46 = vmul.f32 %v1044_v35, %v1044_v35  ;;  %v137_v24 = vmul.f32 %v1047_v21, %v1047_v21 }
  0xaf   :  { %v1056_v47 = vsub.f32 %v968_v28, %v106_v42  ;;  %v1059_v25 = vsub.f32 %v973_v29, %v107_v43  ;;  %v176_v48 = vsel %vm42_vm0, %v136_v46, 0.0  ;;  %v179_v49 = vsel %vm42_vm0, %v137_v24, 0.0  ;;  %v809_v29 = vld [vmem:[%s1348_s3] sm:$0xff]  }
  0xb0   :  { %174 = vadd.xlane.f32.xlu1 %v173_v41  ;;  %177 = vadd.xlane.f32.xlu0 %v176_v48 }
  0xb1   :  { %v138_v50 = vmul.f32 %v1056_v47, %v1056_v47  ;;  %v139_v51 = vmul.f32 %v1059_v25, %v1059_v25  ;;  %769 = vmatprep.subr.bf16.mxu0 %v809_v29 }
  0xb2   :  { %770 = vmatpush3.bf16.msra.mxu0 %v809_v29 }
  0xb3   :  { %v182_v52 = vsel %vm42_vm0, %v138_v50, 0.0  ;;  %v185_v28 = vsel %vm42_vm0, %v139_v51, 0.0  ;;  %771 = vmatprep.subr.bf16.mxu0 %v811_v56 }
  0xb4   :  { %180 = vadd.xlane.f32.xlu1 %v179_v49  ;;  %183 = vadd.xlane.f32.xlu0 %v182_v52 }
  0xb6   :  { %772 = vmatpush3.bf16.msra.mxu0 %v811_v56 }
  0xb8   :  { %186 = vadd.xlane.f32.xlu1 %v185_v28 }
 0x125   :  { %v142_v58 = vpop.xlane.xlu0 %141 }
 0x126   :  { %v188_v59 = vmul.f32 0.03125, %v142_v58 }
 0x128   :  { %v204_v60 = vadd.f32 1e-05, %v188_v59 }
 0x129   :  { %v145_v61 = vpop.xlane.xlu1 %144  ;;  %v148_v62 = vpop.xlane.xlu0 %147 }
 0x12a   :  { %813 = vrsqrt.f32 %v204_v60  ;;  %v189_v63 = vmul.f32 0.03125, %v145_v61  ;;  %v190_v2 = vmul.f32 0.03125, %v148_v62 }
 0x12c   :  { %v205_v3 = vadd.f32 1e-05, %v189_v63  ;;  %v206_v4 = vadd.f32 1e-05, %v190_v2 }
 0x12d   :  { %v151_v5 = vpop.xlane.xlu1 %150  ;;  %v154_v6 = vpop.xlane.xlu0 %153 }
 0x12e   :  { %815 = vrsqrt.f32 %v205_v3  ;;  %v191_v7 = vmul.f32 0.03125, %v151_v5  ;;  %v192_v8 = vmul.f32 0.03125, %v154_v6 }
 0x12f   :  { %817 = vrsqrt.f32 %v206_v4 }
 0x130   :  { %v207_v9 = vadd.f32 1e-05, %v191_v7  ;;  %v208_v12 = vadd.f32 1e-05, %v192_v8 }
 0x131   :  { %v157_v13 = vpop.xlane.xlu1 %156  ;;  %v160_v14 = vpop.xlane.xlu0 %159 }
 0x132   :  { %819 = vrsqrt.f32 %v207_v9  ;;  %v193_v15 = vmul.f32 0.03125, %v157_v13  ;;  %v194_v18 = vmul.f32 0.03125, %v160_v14 }
 0x133   :  { %821 = vrsqrt.f32 %v208_v12 }
 0x134   :  { %v814_v19 = vpop.eup %813  ;;  %v209_v22 = vadd.f32 1e-05, %v193_v15  ;;  %v210_v16 = vadd.f32 1e-05, %v194_v18 }
 0x135   :  { %v163_v27 = vpop.xlane.xlu1 %162  ;;  %v166_v30 = vpop.xlane.xlu0 %165  ;;  %v236_v31 = vmul.f32 %v814_v19, %v979_v36 }
 0x136   :  { %823 = vrsqrt.f32 %v209_v22  ;;  %v195_v32 = vmul.f32 0.03125, %v163_v27  ;;  %v196_v33 = vmul.f32 0.03125, %v166_v30 }
 0x137   :  { %825 = vrsqrt.f32 %v210_v16  ;;  %v258_v20 = vmul.f32 %v1084_v26, %v236_v31 }
 0x138   :  { %v816_v38 = vpop.eup %815  ;;  %v211_v39 = vadd.f32 1e-05, %v195_v32  ;;  %v212_v40 = vadd.f32 1e-05, %v196_v33 }
 0x139   :  { %v818_v41 = vpop.eup %817  ;;  %v169_v42 = vpop.xlane.xlu1 %168  ;;  %v237_v46 = vmul.f32 %v816_v38, %v987_v44  ;;  %v280_v36 = vadd.f32 %v1090_v34, %v258_v20 }
 0x13a   :  { %v172_v43 = vpop.xlane.xlu0 %171  ;;  %v238_v24 = vmul.f32 %v818_v41, %v981_v37  ;;  %827 = vrsqrt.f32 %v211_v39  ;;  %v197_v48 = vmul.f32 0.03125, %v169_v42 }
 0x13b   :  { %v198_v49 = vmul.f32 0.03125, %v172_v43  ;;  %829 = vrsqrt.f32 %v212_v40  ;;  %v259_v50 = vmul.f32 %v1084_v26, %v237_v46  ;;  %v296_v59 = vmax.f32 %v280_v36, 0.0 }
 0x13c   :  { %v820_v51 = vpop.eup %819  ;;  %v213_v52 = vadd.f32 1e-05, %v197_v48  ;;  %v260_v29 = vmul.f32 %v1084_v26, %v238_v24 }
 0x13d   :  { %v214_v28 = vadd.f32 1e-05, %v198_v49  ;;  %v822_v53 = vpop.eup %821  ;;  %v239_v56 = vmul.f32 %v820_v51, %v989_v45  ;;  %v175_v57 = vpop.xlane.xlu1 %174  ;;  %v281_v58 = vadd.f32 %v1090_v34, %v259_v50 }
 0x13e   :  { %v178_v44 = vpop.xlane.xlu0 %177  ;;  %v240_v37 = vmul.f32 %v822_v53, %v997_v54  ;;  %831 = vrsqrt.f32 %v213_v52  ;;  %v199_v60 = vmul.f32 0.03125, %v175_v57  ;;  %v282_v2 = vadd.f32 %v1090_v34, %v260_v29 }
 0x13f   :  { %v200_v61 = vmul.f32 0.03125, %v178_v44  ;;  %833 = vrsqrt.f32 %v214_v28  ;;  %v297_v62 = vmax.f32 %v281_v58, 0.0  ;;  %v261_v63 = vmul.f32 %v1084_v26, %v239_v56 }
 0x140   :  { %v824_v3 = vpop.eup %823  ;;  %v215_v4 = vadd.f32 1e-05, %v199_v60  ;;  %v262_v45 = vmul.f32 %v1084_v26, %v240_v37  ;;  %v298_v13 = vmax.f32 %v282_v2, 0.0 }
 0x141   :  { %v216_v5 = vadd.f32 1e-05, %v200_v61  ;;  %v826_v6 = vpop.eup %825  ;;  %v241_v7 = vmul.f32 %v824_v3, %v999_v55  ;;  %v181_v8 = vpop.xlane.xlu1 %180  ;;  %v312_v54 = vpack.c.bf16 %v297_v62, %v296_v59  ;;  %v283_v12 = vadd.f32 %v1090_v34, %v261_v63 }
 0x142   :  { %v184_v9 = vpop.xlane.xlu0 %183  ;;  %v242_v14 = vmul.f32 %v826_v6, %v1008_v0  ;;  %835 = vrsqrt.f32 %v215_v4  ;;  %v201_v15 = vmul.f32 0.03125, %v181_v8  ;;  %v284_v55 = vadd.f32 %v1090_v34, %v262_v45 }
 0x143   :  { %v202_v18 = vmul.f32 0.03125, %v184_v9  ;;  %837 = vrsqrt.f32 %v216_v5  ;;  %773 = vmatprep.mubr.msk.bf16.mxu0 %vm42_vm0, %v312_v54  ;;  %793 = vmatprep.mubr.msk.bf16.mxu1 %vm42_vm0, %v312_v54  ;;  %v299_v19 = vmax.f32 %v283_v12, 0.0  ;;  %v263_v22 = vmul.f32 %v1084_v26, %v241_v7 }
 0x144   :  { %v828_v16 = vpop.eup %827  ;;  %v217_v27 = vadd.f32 1e-05, %v201_v15  ;;  %v264_v31 = vmul.f32 %v1084_v26, %v242_v14  ;;  %v300_v41 = vmax.f32 %v284_v55, 0.0 }
 0x145   :  { %v218_v30 = vadd.f32 1e-05, %v202_v18  ;;  %v830_v32 = vpop.eup %829  ;;  %v243_v0 = vmul.f32 %v828_v16, %v1011_v1  ;;  %v187_v33 = vpop.xlane.xlu1 %186  ;;  %v313_v20 = vpack.c.bf16 %v299_v19, %v298_v13  ;;  %v285_v38 = vadd.f32 %v1090_v34, %v263_v22 }
 0x146   :  { %v244_v39 = vmul.f32 %v830_v32, %v1020_v10  ;;  %839 = vrsqrt.f32 %v217_v27  ;;  %v203_v40 = vmul.f32 0.03125, %v187_v33  ;;  %v286_v46 = vadd.f32 %v1090_v34, %v264_v31 }
 0x147   :  { %841 = vrsqrt.f32 %v218_v30  ;;  %774 = vmatmul.mubr.msk.bf16.vlgmr.msra.gmra.mrb[0].mxu0 %vm42_vm0, %v313_v20  ;;  %794 = vmatmul.mubr.msk.bf16.vlgmr.msra.gmra.mrb[0].mxu1 %vm42_vm0, %v313_v20  ;;  %v301_v42 = vmax.f32 %v285_v38, 0.0  ;;  %v265_v43 = vmul.f32 %v1084_v26, %v243_v0 }
 0x148   :  { %v832_v1 = vpop.eup %831  ;;  %v219_v36 = vadd.f32 1e-05, %v203_v40  ;;  %v266_v24 = vmul.f32 %v1084_v26, %v244_v39  ;;  %v302_v52 = vmax.f32 %v286_v46, 0.0 }
 0x149   :  { %v834_v48 = vpop.eup %833  ;;  %v245_v10 = vmul.f32 %v832_v1, %v1023_v11  ;;  %v314_v49 = vpack.c.bf16 %v301_v42, %v300_v41  ;;  %v287_v50 = vadd.f32 %v1090_v34, %v265_v43 }
 0x14a   :  { %v246_v51 = vmul.f32 %v834_v48, %v1032_v23  ;;  %843 = vrsqrt.f32 %v219_v36  ;;  %v288_v53 = vadd.f32 %v1090_v34, %v266_v24 }
 0x14b   :  { %777 = vmatprep.mubr.msk.bf16.mxu0 %vm42_vm0, %v314_v49  ;;  %797 = vmatprep.mubr.msk.bf16.mxu1 %vm42_vm0, %v314_v49  ;;  %v303_v28 = vmax.f32 %v287_v50, 0.0  ;;  %v267_v29 = vmul.f32 %v1084_v26, %v245_v10 }
 0x14c   :  { %v836_v56 = vpop.eup %835  ;;  %v268_v57 = vmul.f32 %v1084_v26, %v246_v51  ;;  %v304_v37 = vmax.f32 %v288_v53, 0.0 }
 0x14d   :  { %v838_v11 = vpop.eup %837  ;;  %v247_v44 = vmul.f32 %v836_v56, %v1035_v17  ;;  %v315_v58 = vpack.c.bf16 %v303_v28, %v302_v52  ;;  %v289_v23 = vadd.f32 %v1090_v34, %v267_v29 }
 0x14e   :  { %v248_v59 = vmul.f32 %v838_v11, %v1044_v35  ;;  %v290_v62 = vadd.f32 %v1090_v34, %v268_v57 }
 0x14f   :  { %778 = vmatmul.mubr.msk.bf16.gmra.mrb[4].mxu0 %vm42_vm0, %v315_v58  ;;  %798 = vmatmul.mubr.msk.bf16.gmra.mrb[4].mxu1 %vm42_vm0, %v315_v58  ;;  %v305_v60 = vmax.f32 %v289_v23, 0.0  ;;  %v269_v61 = vmul.f32 %v1084_v26, %v247_v44 }
 0x150   :  { %v840_v63 = vpop.eup %839  ;;  %v270_v2 = vmul.f32 %v1084_v26, %v248_v59  ;;  %v306_v45 = vmax.f32 %v290_v62, 0.0 }
 0x151   :  { %v842_v3 = vpop.eup %841  ;;  %v249_v17 = vmul.f32 %v840_v63, %v1047_v21  ;;  %v316_v4 = vpack.c.bf16 %v305_v60, %v304_v37  ;;  %v291_v5 = vadd.f32 %v1090_v34, %v269_v61 }
 0x152   :  { %v250_v35 = vmul.f32 %v842_v3, %v1056_v47  ;;  %v292_v8 = vadd.f32 %v1090_v34, %v270_v2 }
 0x153   :  { %781 = vmatprep.mubr.msk.bf16.mxu0 %vm42_vm0, %v316_v4  ;;  %801 = vmatprep.mubr.msk.bf16.mxu1 %vm42_vm0, %v316_v4  ;;  %v307_v6 = vmax.f32 %v291_v5, 0.0  ;;  %v271_v7 = vmul.f32 %v1084_v26, %v249_v17 }
 0x154   :  { %v844_v9 = vpop.eup %843  ;;  %v272_v54 = vmul.f32 %v1084_v26, %v250_v35  ;;  %v308_v47 = vmax.f32 %v292_v8, 0.0 }
 0x155   :  { %v251_v21 = vmul.f32 %v844_v9, %v1059_v25  ;;  %v317_v12 = vpack.c.bf16 %v307_v6, %v306_v45  ;;  %v293_v13 = vadd.f32 %v1090_v34, %v271_v7 }
 0x156   :  { %v294_v18 = vadd.f32 %v1090_v34, %v272_v54 }
 0x157   :  { %782 = vmatmul.mubr.msk.bf16.gmra.mrb[8].mxu0 %vm42_vm0, %v317_v12  ;;  %802 = vmatmul.mubr.msk.bf16.gmra.mrb[8].mxu1 %vm42_vm0, %v317_v12  ;;  %v309_v14 = vmax.f32 %v293_v13, 0.0  ;;  %v273_v15 = vmul.f32 %v1084_v26, %v251_v21 }
 0x158   :  { %v310_v25 = vmax.f32 %v294_v18, 0.0 }
 0x159   :  { %v318_v19 = vpack.c.bf16 %v309_v14, %v308_v47  ;;  %v295_v22 = vadd.f32 %v1090_v34, %v273_v15 }
 0x15b   :  { %785 = vmatprep.mubr.msk.bf16.mxu0 %vm42_vm0, %v318_v19  ;;  %805 = vmatprep.mubr.msk.bf16.mxu1 %vm42_vm0, %v318_v19  ;;  %v311_v55 = vmax.f32 %v295_v22, 0.0 }
 0x15d   :  { %v319_v16 = vpack.c.bf16 %v311_v55, %v310_v25 }
 0x15f   :  { %786 = vmatmul.mubr.msk.bf16.gmra.mrb[12].mxu0 %vm42_vm0, %v319_v16  ;;  %806 = vmatmul.mubr.msk.bf16.gmra.mrb[12].mxu1 %vm42_vm0, %v319_v16 }
 0x21a   :  { %v775_v27 = vpop.f32.mrb[0].mxu0  ;;  %v795_v30 = vpop.f32.mrb[0].mxu1 }
 0x21b   :  { %572 = vst.msk [vmem:[%s1352_s5 + $0x10] sm:$0xff] %vm42_vm0, %v775_v27  ;;  %v735_v26 = vpack.c.bf16 %v775_v27, %v775_v27  ;;  %588 = vst.msk [vmem:[%s1353_s6 + $0x10] sm:$0xff] %vm42_vm0, %v795_v30  ;;  %v394_v34 = vpop.f32.mrb[1].mxu0  ;;  %v507_v31 = vpop.f32.mrb[1].mxu1 }
 0x21c   :  { %570 = vst.msk [vmem:[%s1352_s5] sm:$0xff] %vm42_vm0, %v394_v34  ;;  %v733_v32 = vpack.c.bf16 %v394_v34, %v394_v34  ;;  %586 = vst.msk [vmem:[%s1353_s6] sm:$0xff] %vm42_vm0, %v507_v31  ;;  %v776_v0 = vpop.f32.mrb[2].mxu0  ;;  %v796_v33 = vpop.f32.mrb[2].mxu1 }
 0x21d   :  { %669 = vst.msk [vmem:[%s1354_s7 + $0x8] sm:$0xf] %vm666_vm1, %v735_v26  ;;  %v736_v20 = vpack.c.bf16 %v776_v0, %v776_v0  ;;  %v397_v38 = vpop.f32.mrb[3].mxu0  ;;  %v510_v39 = vpop.f32.mrb[3].mxu1 }
 0x21e   :  { %573 = vst.msk [vmem:[%s1352_s5 + $0x18] sm:$0xff] %vm42_vm0, %v776_v0  ;;  %589 = vst.msk [vmem:[%s1353_s6 + $0x18] sm:$0xff] %vm42_vm0, %v796_v33  ;;  %v734_v40 = vpack.c.bf16 %v397_v38, %v397_v38 }
 0x21f   :  { %667 = vst.msk [vmem:[%s1354_s7] sm:$0xf] %vm666_vm1, %v733_v32  ;;  %670 = vst.msk [vmem:[%s1354_s7 + $0xc] sm:$0xf] %vm666_vm1, %v736_v20 }
 0x220   :  { %571 = vst.msk [vmem:[%s1352_s5 + $0x8] sm:$0xff] %vm42_vm0, %v397_v38  ;;  %587 = vst.msk [vmem:[%s1353_s6 + $0x8] sm:$0xff] %vm42_vm0, %v510_v39 }
 0x221   :  { %668 = vst.msk [vmem:[%s1354_s7 + $0x4] sm:$0xf] %vm666_vm1, %v734_v40 }
 0x222   :  { %v779_v41 = vpop.f32.mrb[4].mxu0  ;;  %v799_v42 = vpop.f32.mrb[4].mxu1 }
 0x223   :  { %576 = vst.msk [vmem:[%s1352_s5 + $0x30] sm:$0xff] %vm42_vm0, %v779_v41  ;;  %v739_v43 = vpack.c.bf16 %v779_v41, %v779_v41  ;;  %592 = vst.msk [vmem:[%s1353_s6 + $0x30] sm:$0xff] %vm42_vm0, %v799_v42  ;;  %v410_v46 = vpop.f32.mrb[5].mxu0  ;;  %v523_v1 = vpop.f32.mrb[5].mxu1 }
 0x224   :  { %574 = vst.msk [vmem:[%s1352_s5 + $0x20] sm:$0xff] %vm42_vm0, %v410_v46  ;;  %v737_v36 = vpack.c.bf16 %v410_v46, %v410_v46  ;;  %590 = vst.msk [vmem:[%s1353_s6 + $0x20] sm:$0xff] %vm42_vm0, %v523_v1  ;;  %v780_v24 = vpop.f32.mrb[6].mxu0  ;;  %v800_v48 = vpop.f32.mrb[6].mxu1 }
 0x225   :  { %673 = vst.msk [vmem:[%s1354_s7 + $0x18] sm:$0xf] %vm666_vm1, %v739_v43  ;;  %v740_v10 = vpack.c.bf16 %v780_v24, %v780_v24  ;;  %v413_v49 = vpop.f32.mrb[7].mxu0  ;;  %v526_v50 = vpop.f32.mrb[7].mxu1 }
 0x226   :  { %577 = vst.msk [vmem:[%s1352_s5 + $0x38] sm:$0xff] %vm42_vm0, %v780_v24  ;;  %593 = vst.msk [vmem:[%s1353_s6 + $0x38] sm:$0xff] %vm42_vm0, %v800_v48  ;;  %v738_v51 = vpack.c.bf16 %v413_v49, %v413_v49 }
 0x227   :  { %671 = vst.msk [vmem:[%s1354_s7 + $0x10] sm:$0xf] %vm666_vm1, %v737_v36  ;;  %674 = vst.msk [vmem:[%s1354_s7 + $0x1c] sm:$0xf] %vm666_vm1, %v740_v10 }
 0x228   :  { %575 = vst.msk [vmem:[%s1352_s5 + $0x28] sm:$0xff] %vm42_vm0, %v413_v49  ;;  %591 = vst.msk [vmem:[%s1353_s6 + $0x28] sm:$0xff] %vm42_vm0, %v526_v50 }
 0x229   :  { %672 = vst.msk [vmem:[%s1354_s7 + $0x14] sm:$0xf] %vm666_vm1, %v738_v51 }
 0x22a   :  { %v783_v52 = vpop.f32.mrb[8].mxu0  ;;  %v803_v28 = vpop.f32.mrb[8].mxu1 }
 0x22b   :  { %580 = vst.msk [vmem:[%s1352_s5 + $0x50] sm:$0xff] %vm42_vm0, %v783_v52  ;;  %v743_v29 = vpack.c.bf16 %v783_v52, %v783_v52  ;;  %596 = vst.msk [vmem:[%s1353_s6 + $0x50] sm:$0xff] %vm42_vm0, %v803_v28  ;;  %v426_v53 = vpop.f32.mrb[9].mxu0  ;;  %v539_v56 = vpop.f32.mrb[9].mxu1 }
 0x22c   :  { %578 = vst.msk [vmem:[%s1352_s5 + $0x40] sm:$0xff] %vm42_vm0, %v426_v53  ;;  %v741_v57 = vpack.c.bf16 %v426_v53, %v426_v53  ;;  %594 = vst.msk [vmem:[%s1353_s6 + $0x40] sm:$0xff] %vm42_vm0, %v539_v56  ;;  %v784_v11 = vpop.f32.mrb[10].mxu0  ;;  %v804_v44 = vpop.f32.mrb[10].mxu1 }
 0x22d   :  { %677 = vst.msk [vmem:[%s1354_s7 + $0x28] sm:$0xf] %vm666_vm1, %v743_v29  ;;  %v744_v58 = vpack.c.bf16 %v784_v11, %v784_v11  ;;  %v429_v23 = vpop.f32.mrb[11].mxu0  ;;  %v542_v59 = vpop.f32.mrb[11].mxu1 }
 0x22e   :  { %581 = vst.msk [vmem:[%s1352_s5 + $0x58] sm:$0xff] %vm42_vm0, %v784_v11  ;;  %597 = vst.msk [vmem:[%s1353_s6 + $0x58] sm:$0xff] %vm42_vm0, %v804_v44  ;;  %v742_v37 = vpack.c.bf16 %v429_v23, %v429_v23 }
 0x22f   :  { %675 = vst.msk [vmem:[%s1354_s7 + $0x20] sm:$0xf] %vm666_vm1, %v741_v57  ;;  %678 = vst.msk [vmem:[%s1354_s7 + $0x2c] sm:$0xf] %vm666_vm1, %v744_v58 }
 0x230   :  { %579 = vst.msk [vmem:[%s1352_s5 + $0x48] sm:$0xff] %vm42_vm0, %v429_v23  ;;  %595 = vst.msk [vmem:[%s1353_s6 + $0x48] sm:$0xff] %vm42_vm0, %v542_v59 }
 0x231   :  { %676 = vst.msk [vmem:[%s1354_s7 + $0x24] sm:$0xf] %vm666_vm1, %v742_v37 }
 0x232   :  { %v787_v60 = vpop.f32.mrb[12].mxu0  ;;  %v807_v61 = vpop.f32.mrb[12].mxu1 }
 0x233   :  { %584 = vst.msk [vmem:[%s1352_s5 + $0x70] sm:$0xff] %vm42_vm0, %v787_v60  ;;  %v747_v62 = vpack.c.bf16 %v787_v60, %v787_v60  ;;  %600 = vst.msk [vmem:[%s1353_s6 + $0x70] sm:$0xff] %vm42_vm0, %v807_v61  ;;  %v442_v63 = vpop.f32.mrb[13].mxu0  ;;  %v555_v2 = vpop.f32.mrb[13].mxu1 }
 0x234   :  { %582 = vst.msk [vmem:[%s1352_s5 + $0x60] sm:$0xff] %vm42_vm0, %v442_v63  ;;  %v745_v3 = vpack.c.bf16 %v442_v63, %v442_v63  ;;  %598 = vst.msk [vmem:[%s1353_s6 + $0x60] sm:$0xff] %vm42_vm0, %v555_v2  ;;  %v788_v17 = vpop.f32.mrb[14].mxu0  ;;  %v808_v4 = vpop.f32.mrb[14].mxu1 }
 0x235   :  { %681 = vst.msk [vmem:[%s1354_s7 + $0x38] sm:$0xf] %vm666_vm1, %v747_v62  ;;  %v748_v5 = vpack.c.bf16 %v788_v17, %v788_v17  ;;  %v445_v35 = vpop.f32.mrb[15].mxu0  ;;  %v558_v45 = vpop.f32.mrb[15].mxu1 }
 0x236   :  { %585 = vst.msk [vmem:[%s1352_s5 + $0x78] sm:$0xff] %vm42_vm0, %v788_v17  ;;  %601 = vst.msk [vmem:[%s1353_s6 + $0x78] sm:$0xff] %vm42_vm0, %v808_v4  ;;  %v746_v6 = vpack.c.bf16 %v445_v35, %v445_v35 }
 0x237   :  { %679 = vst.msk [vmem:[%s1354_s7 + $0x30] sm:$0xf] %vm666_vm1, %v745_v3  ;;  %682 = vst.msk [vmem:[%s1354_s7 + $0x3c] sm:$0xf] %vm666_vm1, %v748_v5 }
 0x238   :  { %583 = vst.msk [vmem:[%s1352_s5 + $0x68] sm:$0xff] %vm42_vm0, %v445_v35  ;;  %599 = vst.msk [vmem:[%s1353_s6 + $0x68] sm:$0xff] %vm42_vm0, %v558_v45 }
 0x239   :  { %680 = vst.msk [vmem:[%s1354_s7 + $0x34] sm:$0xf] %vm666_vm1, %v746_v6 }

</bundles_post_ra>
